<compile_context>
chip_gen: v5e
topology: v5e:2x2
jax: 0.10.0
libtpu: 0.0.40
codegen_flags: <defaults>
</compile_context>

<pallas_src>
import functools
import math

import jax
import jax.numpy as jnp
from jax.experimental import pallas as pl
from jax.experimental.pallas import tpu as pltpu

LANE = 128
SUBLANE = 8
MAX_BLOCK_ROWS = 2048   # (2048, 128) f32 block = 1 MiB per input per buffer


def _awl_elementwise(pred_f32, targ_f32, *, omega, theta, epsilon, alpha):
    """Elementwise adaptive-wing loss in f32 (shared by kernel and JAX tail)."""
    y = targ_f32
    delta_y = jnp.abs(y - pred_f32)
    a_minus_y = alpha - y

    # Branch 1 (delta_y < theta): omega * log1p((delta_y/omega) ** (alpha-y)).
    # power written as exp(p * log(r)); for r >= 0 the only case differing
    # from pow semantics is 0**0 == 1, guarded with a cheap select.
    r = delta_y * (1.0 / omega)
    pw = jnp.exp(a_minus_y * jnp.log(r))
    pw = jnp.where((r == 0.0) & (a_minus_y == 0.0), 1.0, pw)
    loss1 = omega * jnp.log1p(pw)

    # Branch 2 (delta_y >= theta), t = theta/epsilon, z = (alpha-y)*ln(t):
    #   s = t**(alpha-y) / (1 + t**(alpha-y)) = sigmoid(z) = 0.5*(1+tanh(z/2))
    #   A = omega/(1+t**(alpha-y)) * (alpha-y) * t**(alpha-y-1) / epsilon
    #     = (omega/theta) * (alpha-y) * s
    #   log1p(t**(alpha-y)) = -log1p(-s)
    ln_t = math.log(theta / epsilon)
    z = a_minus_y * ln_t
    s = 0.5 * (1.0 + jnp.tanh(0.5 * z))
    A = (omega / theta) * a_minus_y * s
    C = theta * A + omega * jnp.log1p(-s)
    loss2 = A * delta_y - C

    return jnp.where(delta_y < theta, loss1, loss2)


def _awl_kernel(pred_ref, targ_ref, out_ref, *, loss_fn, nb, block_rows, rows):
    c = pl.program_id(0)   # core-parallel axis
    i = pl.program_id(1)   # reduction axis ("arbitrary"); out block resident

    @pl.when(i == 0)
    def _():
        out_ref[...] = jnp.zeros_like(out_ref)

    # Inputs stream in their native dtype; cast to f32 after the read.
    loss = loss_fn(pred_ref[...].astype(jnp.float32),
                   targ_ref[...].astype(jnp.float32))

    # Mask rows outside the real array: the partial last block and any clamped
    # duplicate step introduced by the per-core split (fully masked there).
    intended_blk = c * nb + i
    valid_rows = rows - intended_blk * block_rows
    row_ids = jax.lax.broadcasted_iota(jnp.int32, (block_rows, LANE), 0)
    loss = jnp.where(row_ids < valid_rows, loss, 0.0)

    # VALU-only tree reduce over vregs: (block_rows, 128) -> one (8, 128) vreg.
    out_ref[...] += jnp.sum(
        loss.reshape(block_rows // SUBLANE, SUBLANE, LANE), axis=0)


def _num_tensorcores():
    """TensorCores per JAX device (best effort; both answers are correct)."""
    try:
        kind = jax.devices()[0].device_kind.lower()
    except Exception:
        return 1
    if ("v5 lite" in kind) or ("v5e" in kind) or ("v6" in kind) or \
       ("v3" in kind) or ("v2" in kind):
        return 1            # single TensorCore per device
    if ("v4" in kind) or ("v5p" in kind) or ("v7" in kind) or ("tpu7" in kind):
        return 2            # megacore / dual-TC generations
    return 1


def adaptive_wing_loss(pred, target, *, omega=14.0, theta=0.5,
                       epsilon=1.0, alpha=2.1):
    """Pallas TPU implementation of AdaptiveWingLoss.forward (mean reduction)."""
    assert pred.shape == target.shape
    assert theta > 0.0 and epsilon > 0.0
    n = pred.size
    assert n > 0

    ew = functools.partial(_awl_elementwise, omega=float(omega),
                           theta=float(theta), epsilon=float(epsilon),
                           alpha=float(alpha))

    rows = n // LANE
    n_main = rows * LANE
    rem = n - n_main

    if rem:
        # TODO(synk): the n % 128 != 0 path costs one XLA slice copy of the
        # bulk; a 1-D-block kernel with in-kernel tail masking would avoid it.
        p_flat = pred.reshape(-1)
        t_flat = target.reshape(-1)
        tail = jnp.sum(ew(p_flat[n_main:].astype(jnp.float32),
                          t_flat[n_main:].astype(jnp.float32)))
        if rows == 0:
            return tail / jnp.float32(n)
        p2 = p_flat[:n_main].reshape(rows, LANE)
        t2 = t_flat[:n_main].reshape(rows, LANE)
    else:
        tail = jnp.float32(0.0)
        # Free bitcast reshapes; no pad, no dtype cast, no extra HBM pass.
        p2 = pred.reshape(rows, LANE)
        t2 = target.reshape(rows, LANE)

    # block_rows is a multiple of 16 so sublane tiling holds for f32 and bf16.
    block_rows = min(MAX_BLOCK_ROWS, -(-rows // 16) * 16)
    num_blocks = -(-rows // block_rows)                    # ceil
    ncores = _num_tensorcores() if num_blocks >= 2 else 1
    nb = -(-num_blocks // ncores)                          # blocks per core

    kernel = functools.partial(_awl_kernel, loss_fn=ew, nb=nb,
                               block_rows=block_rows, rows=rows)

    def in_map(c, i):
        # Clamp so no DMA ever targets a block beyond the array; clamped
        # duplicate steps are fully masked inside the kernel.
        return (jnp.minimum(c * nb + i, num_blocks - 1), 0)

    partials = pl.pallas_call(
        kernel,
        out_shape=jax.ShapeDtypeStruct((ncores * SUBLANE, LANE), jnp.float32),
        grid_spec=pltpu.PrefetchScalarGridSpec(
            num_scalar_prefetch=0,
            grid=(ncores, nb),
            in_specs=[
                pl.BlockSpec((block_rows, LANE), in_map),
                pl.BlockSpec((block_rows, LANE), in_map),
            ],
            out_specs=pl.BlockSpec((SUBLANE, LANE), lambda c, i: (c, 0)),
        ),
        compiler_params=pltpu.CompilerParams(
            dimension_semantics=("parallel", "arbitrary")),
    )(p2, t2)

    # (sum loss1 + sum loss2) / (len(loss1) + len(loss2)) == total / n.
    return (jnp.sum(partials) + tail) / jnp.float32(n)


def _reference_awl(pred, target, omega=14.0, theta=0.5, epsilon=1.0, alpha=2.1):
    """Pure-JAX reference (mirrors the PyTorch module)."""
    y = target.astype(jnp.float32)
    y_hat = pred.astype(jnp.float32)
    dy = jnp.abs(y - y_hat)
    loss1 = omega * jnp.log1p(jnp.power(dy / omega, alpha - y))
    t = theta / epsilon
    pow_t = jnp.power(t, alpha - y)
    A = omega * (1.0 / (1.0 + pow_t)) * (alpha - y) * \
        jnp.power(t, alpha - y - 1.0) / epsilon
    C = theta * A - omega * jnp.log1p(pow_t)
    loss2 = A * dy - C
    loss = jnp.where(dy < theta, loss1, loss2)
    return jnp.sum(loss) / loss.size


if __name__ == "__main__":
    key = jax.random.PRNGKey(0)
    k1, k2 = jax.random.split(key)

    # pred/target of shape BxNxHxH (B=2, N=4, H=16), heatmap-like values in [0, 1].
    pred = jax.random.uniform(k1, (2, 4, 16, 16), dtype=jnp.float32)
    target = jax.random.uniform(k2, (2, 4, 16, 16), dtype=jnp.float32)

    loss = adaptive_wing_loss(pred, target)
    loss = jax.block_until_ready(loss)
    ref = _reference_awl(pred, target)
    assert jnp.allclose(loss, ref, rtol=1e-4, atol=1e-4), (loss, ref)

    # Also exercise the native-dtype (bf16) ingestion path.
    pred_bf = pred.astype(jnp.bfloat16)
    target_bf = target.astype(jnp.bfloat16)
    loss_bf = jax.block_until_ready(adaptive_wing_loss(pred_bf, target_bf))
    ref_bf = _reference_awl(pred_bf, target_bf)
    assert jnp.allclose(loss_bf, ref_bf, rtol=1e-4, atol=1e-4), (loss_bf, ref_bf)

    print("KERNEL_OK")
</pallas_src>

<mosaic_0001>
module attributes {stable_mosaic.version = 11 : i64} {
  func.func @_awl_kernel(%arg0: i32, %arg1: i32, %arg2: memref<16x128xf32, #tpu.memory_space<vmem>>, %arg3: memref<16x128xf32, #tpu.memory_space<vmem>>, %arg4: memref<8x128xf32, #tpu.memory_space<vmem>>) attributes {dimension_semantics = [#tpu.dimension_semantics<parallel>, #tpu.dimension_semantics<arbitrary>], iteration_bounds = array<i64: 1, 1>, scalar_prefetch = 0 : i64, scratch_operands = 0 : i64, tpu.core_type = #tpu.core_type<tc>, window_params = [{transform_indices = @transform_0, window_bounds = array<i64: 16, 128>}, {transform_indices = @transform_1, window_bounds = array<i64: 16, 128>}, {transform_indices = @transform_2, window_bounds = array<i64: 8, 128>}]} {
    %c0_i32 = arith.constant 0 : i32
    %0 = arith.cmpi eq, %arg1, %c0_i32 : i32
    %1 = arith.extui %0 : i1 to i32
    %c0_i32_0 = arith.constant 0 : i32
    %2 = arith.cmpi ne, %1, %c0_i32_0 : i32
    scf.if %2 {
      %cst_25 = arith.constant 0.000000e+00 : f32
      %63 = vector.broadcast %cst_25 : f32 to vector<8x128xf32>
      %c0_26 = arith.constant 0 : index
      %c0_27 = arith.constant 0 : index
      %64 = vector.load %arg4[%c0_26, %c0_27] : memref<8x128xf32, #tpu.memory_space<vmem>>, vector<8x128xf32>
      tpu.vector_store %arg4[%c0_26, %c0_27], %63 {strides = array<i32>} : memref<8x128xf32, #tpu.memory_space<vmem>>, vector<8x128xf32>,
    } else {
    }
    %c0 = arith.constant 0 : index
    %c0_1 = arith.constant 0 : index
    %3 = vector.load %arg2[%c0, %c0_1] : memref<16x128xf32, #tpu.memory_space<vmem>>, vector<16x128xf32>
    %c0_2 = arith.constant 0 : index
    %c0_3 = arith.constant 0 : index
    %4 = vector.load %arg3[%c0_2, %c0_3] : memref<16x128xf32, #tpu.memory_space<vmem>>, vector<16x128xf32>
    %5 = arith.subf %4, %3 : vector<16x128xf32>
    %6 = math.absf %5 : vector<16x128xf32>
    %cst = arith.constant 2.100000e+00 : f32
    %7 = vector.broadcast %cst : f32 to vector<16x128xf32>
    %8 = arith.subf %7, %4 : vector<16x128xf32>
    %cst_4 = arith.constant 0.0714285746 : f32
    %9 = vector.broadcast %cst_4 : f32 to vector<16x128xf32>
    %10 = arith.mulf %6, %9 : vector<16x128xf32>
    %11 = math.log %10 : vector<16x128xf32>
    %12 = arith.mulf %8, %11 : vector<16x128xf32>
    %13 = math.exp %12 : vector<16x128xf32>
    %cst_5 = arith.constant 0.000000e+00 : f32
    %14 = vector.broadcast %cst_5 : f32 to vector<16x128xf32>
    %15 = arith.cmpf oeq, %10, %14 : vector<16x128xf32>
    %cst_6 = arith.constant 0.000000e+00 : f32
    %16 = vector.broadcast %cst_6 : f32 to vector<16x128xf32>
    %17 = arith.cmpf oeq, %8, %16 : vector<16x128xf32>
    %18 = arith.andi %15, %17 : vector<16x128xi1>
    %cst_7 = arith.constant 1.000000e+00 : f32
    %19 = vector.broadcast %cst_7 : f32 to vector<16x128xf32>
    %20 = arith.select %18, %19, %13 : vector<16x128xi1>, vector<16x128xf32>
    %21 = math.log1p %20 : vector<16x128xf32>
    %cst_8 = arith.constant 1.400000e+01 : f32
    %22 = vector.broadcast %cst_8 : f32 to vector<16x128xf32>
    %23 = arith.mulf %22, %21 : vector<16x128xf32>
    %cst_9 = arith.constant -0.693147182 : f32
    %24 = vector.broadcast %cst_9 : f32 to vector<16x128xf32>
    %25 = arith.mulf %8, %24 : vector<16x128xf32>
    %cst_10 = arith.constant 5.000000e-01 : f32
    %26 = vector.broadcast %cst_10 : f32 to vector<16x128xf32>
    %27 = arith.mulf %26, %25 : vector<16x128xf32>
    %28 = math.tanh %27 : vector<16x128xf32>
    %cst_11 = arith.constant 1.000000e+00 : f32
    %29 = vector.broadcast %cst_11 : f32 to vector<16x128xf32>
    %30 = arith.addf %29, %28 : vector<16x128xf32>
    %cst_12 = arith.constant 5.000000e-01 : f32
    %31 = vector.broadcast %cst_12 : f32 to vector<16x128xf32>
    %32 = arith.mulf %31, %30 : vector<16x128xf32>
    %cst_13 = arith.constant 2.800000e+01 : f32
    %33 = vector.broadcast %cst_13 : f32 to vector<16x128xf32>
    %34 = arith.mulf %33, %8 : vector<16x128xf32>
    %35 = arith.mulf %34, %32 : vector<16x128xf32>
    %cst_14 = arith.constant 5.000000e-01 : f32
    %36 = vector.broadcast %cst_14 : f32 to vector<16x128xf32>
    %37 = arith.mulf %36, %35 : vector<16x128xf32>
    %cst_15 = arith.constant 0.000000e+00 : f32
    %38 = vector.broadcast %cst_15 : f32 to vector<16x128xf32>
    %39 = arith.subf %38, %32 : vector<16x128xf32>
    %40 = math.log1p %39 : vector<16x128xf32>
    %cst_16 = arith.constant 1.400000e+01 : f32
    %41 = vector.broadcast %cst_16 : f32 to vector<16x128xf32>
    %42 = arith.mulf %41, %40 : vector<16x128xf32>
    %43 = arith.addf %37, %42 : vector<16x128xf32>
    %44 = arith.mulf %35, %6 : vector<16x128xf32>
    %45 = arith.subf %44, %43 : vector<16x128xf32>
    %cst_17 = arith.constant 5.000000e-01 : f32
    %46 = vector.broadcast %cst_17 : f32 to vector<16x128xf32>
    %47 = arith.cmpf olt, %6, %46 : vector<16x128xf32>
    %48 = arith.select %47, %23, %45 : vector<16x128xi1>, vector<16x128xf32>
    %c1_i32 = arith.constant 1 : i32
    %49 = arith.muli %arg0, %c1_i32 : i32
    %50 = arith.addi %49, %arg1 : i32
    %c16_i32 = arith.constant 16 : i32
    %51 = arith.muli %50, %c16_i32 : i32
    %c16_i32_18 = arith.constant 16 : i32
    %52 = arith.subi %c16_i32_18, %51 : i32
    %53 = tpu.iota {dimensions = array<i32: 0>} : vector<16x128xi32>
    %54 = vector.broadcast %52 : i32 to vector<16x128xi32>
    %55 = arith.cmpi slt, %53, %54 : vector<16x128xi32>
    %cst_19 = arith.constant 0.000000e+00 : f32
    %56 = vector.broadcast %cst_19 : f32 to vector<16x128xf32>
    %57 = arith.select %55, %48, %56 : vector<16x128xi1>, vector<16x128xf32>
    %c0_20 = arith.constant 0 : index
    %c0_21 = arith.constant 0 : index
    %58 = vector.load %arg4[%c0_20, %c0_21] : memref<8x128xf32, #tpu.memory_space<vmem>>, vector<8x128xf32>
    %59 = vector.shape_cast %57 : vector<16x128xf32> to vector<2x8x128xf32>
    %cst_22 = arith.constant dense<0.000000e+00> : vector<8x128xf32>
    %60 = vector.multi_reduction <add>, %59, %cst_22 [0] : vector<2x8x128xf32> to vector<8x128xf32>
    %61 = arith.addf %58, %60 : vector<8x128xf32>
    %c0_23 = arith.constant 0 : index
    %c0_24 = arith.constant 0 : index
    %62 = vector.load %arg4[%c0_23, %c0_24] : memref<8x128xf32, #tpu.memory_space<vmem>>, vector<8x128xf32>
    tpu.vector_store %arg4[%c0_23, %c0_24], %61 {strides = array<i32>} : memref<8x128xf32, #tpu.memory_space<vmem>>, vector<8x128xf32>,
    return
  }
  func.func @transform_0(%arg0: i32, %arg1: i32) -> (i32, i32) {
    %c1_i32 = arith.constant 1 : i32
    %0 = arith.muli %arg0, %c1_i32 : i32
    %1 = arith.addi %0, %arg1 : i32
    %c0_i32 = arith.constant 0 : i32
    %2 = arith.minsi %1, %c0_i32 : i32
    %c0_i32_0 = arith.constant 0 : i32
    %c0_i32_1 = arith.constant 0 : i32
    return %2, %c0_i32_0 : i32, i32
  }
  func.func @transform_1(%arg0: i32, %arg1: i32) -> (i32, i32) {
    %c1_i32 = arith.constant 1 : i32
    %0 = arith.muli %arg0, %c1_i32 : i32
    %1 = arith.addi %0, %arg1 : i32
    %c0_i32 = arith.constant 0 : i32
    %2 = arith.minsi %1, %c0_i32 : i32
    %c0_i32_0 = arith.constant 0 : i32
    %c0_i32_1 = arith.constant 0 : i32
    return %2, %c0_i32_0 : i32, i32
  }
  func.func @transform_2(%arg0: i32, %arg1: i32) -> (i32, i32) {
    %c0_i32 = arith.constant 0 : i32
    %c0_i32_0 = arith.constant 0 : i32
    return %arg0, %c0_i32 : i32, i32
  }
}

</mosaic_0001>

<bundles_post_ra>
// kernel: tpu_custom_call.1
= control target key start
LH: loop header
LB: loop body
LE: loop exit
PB: predicated region body
PF: predicated region fallthrough
CT: control target
= control target key end

     0   :  { %7 = vsyncpa [#allocation3], 0  ;;  %s347_s0 = inlined_call_operand.hbm [shape: f32[16,128], index: 0, kind: input, shape index: {}]   ;;  %s348_s1 = inlined_call_operand.hbm [shape: f32[16,128], index: 1, kind: input, shape index: {}]   ;;  %s349_s2 = inlined_call_operand.hbm [shape: f32[8,128], index: 2, kind: output, shape index: {}]  }
   0x1   :  { %8 = vsyncpa [#allocation6], 0 }
   0x2   :  { %9 = vsyncpa [#allocation4], 0  ;;  %s20_s11 = sshll.u32 %s347_s0, 4  ;;  %s308_s12 = smov [#allocation2]   ;;  %s21_s11 = int_to_ptr.hbm [resolvable:$true] %s20_s11 }
   0x3   :  { %s22_s13 = sshll.u32 %s308_s12, 4  ;;  %s39_s16 = sshll.u32 %s348_s1, 4  ;;  %s23_s13 = int_to_ptr.vmem [resolvable:$true] %s22_s13  ;;  %s40_s16 = int_to_ptr.hbm [resolvable:$true] %s39_s16 }
   0x4   :  { %s309_s17 = smov 128   ;;  %s310_s18 = smov 8  }
   0x5   :  { %28 = dma.hbm_to_vmem [thread:$0]  %s21_s11, 256, %s23_s13, [#allocation3], %s309_s17, %s309_s17, %s310_s18  }
   0x6   :  { %s311_s19 = smov [#allocation5]  }
   0x7   :  { %s41_s20 = sshll.u32 %s311_s19, 4  ;;  %s42_s20 = int_to_ptr.vmem [resolvable:$true] %s41_s20 }
   0x8   :  { %47 = dma.hbm_to_vmem [thread:$0]  %s40_s16, 256, %s42_s20, [#allocation6], %s309_s17, %s309_s17, %s310_s18  }
   0x9   :  { %302 = dma.done.wait [#allocation3], 256  }
   0xa   :  { %303 = vsyncadd [#allocation3], 4294967040 }
   0xb   :  { %304 = dma.done.wait [#allocation6], 256  }
   0xc   :  { %305 = vsyncadd [#allocation6], 4294967040  ;;  %v69_v0 = vld [vmem:[#allocation2] sm:$0xff]  ;;  %v70_v1 = vld [vmem:[#allocation2 + $0x8] sm:$0xff]  ;;  %s312_s0 = smov [#allocation7]   ;;  %s189_s23 = sshll.u32 %s349_s2, 4  ;;  %s190_s23 = int_to_ptr.hbm [resolvable:$true] %s189_s23 }
   0xd   :  { %v71_v2 = vld [vmem:[#allocation5] sm:$0xff]  ;;  %v72_v3 = vld [vmem:[#allocation5 + $0x8] sm:$0xff]  ;;  %s187_s1 = sshll.u32 %s312_s0, 4  ;;  %s188_s1 = int_to_ptr.vmem [resolvable:$true] %s187_s1 }
   0xe   :  { %v73_v4 = vsub.f32 %v71_v2, %v69_v0  ;;  %v77_v5 = vsub.f32 2.1, %v71_v2  ;;  %v74_v6 = vsub.f32 %v72_v3, %v70_v1  ;;  %v78_v7 = vsub.f32 2.1, %v72_v3 }
  0x10   :  { %v334_v8 = vand.u32 2147483647, %v73_v4  ;;  %v119_v9 = vmul.f32 -0.6931472, %v77_v5  ;;  %v336_v10 = vand.u32 2147483647, %v74_v6 }
  0x11   :  { %v120_v11 = vmul.f32 -0.6931472, %v78_v7  ;;  %vm93_vm1 = vcmp.eq.f32.partialorder %v77_v5, 0.0  ;;  %vm94_vm3 = vcmp.eq.f32.partialorder %v78_v7, 0.0  ;;  %v129_v36 = vmul.f32 28.0, %v77_v5 }
  0x12   :  { %v79_v12 = vmul.f32 0.071428575, %v334_v8  ;;  %v121_v13 = vmul.f32 0.5, %v119_v9  ;;  %v80_v14 = vmul.f32 0.071428575, %v336_v10  ;;  %v130_v37 = vmul.f32 28.0, %v78_v7 }
  0x13   :  { %v122_v15 = vmul.f32 0.5, %v120_v11  ;;  %vm163_vm10 = vcmp.lt.f32.partialorder %v334_v8, 0.5  ;;  %vm164_vm11 = vcmp.lt.f32.partialorder %v336_v10, 0.5 }
  0x14   :  { %210 = vlog2.f32 %v79_v12  ;;  %vm91_vm0 = vcmp.eq.f32.partialorder %v79_v12, 0.0  ;;  %vm92_vm2 = vcmp.eq.f32.partialorder %v80_v14, 0.0 }
  0x15   :  { %212 = vlog2.f32 %v80_v14  ;;  %vm95_vm4 = vmand %vm91_vm0, %vm93_vm1 }
  0x16   :  { %214 = vtanh.f32 %v121_v13  ;;  %vm96_vm5 = vmand %vm92_vm2, %vm94_vm3 }
  0x17   :  { %216 = vtanh.f32 %v122_v15 }
  0x1a   :  { %v211_v16 = vpop.eup %210 }
  0x1b   :  { %v213_v17 = vpop.eup %212  ;;  %v82_v18 = vmul.f32 0.6931472, %v211_v16 }
  0x1c   :  { %v215_v19 = vpop.eup %214  ;;  %v84_v20 = vmul.f32 0.6931472, %v213_v17 }
  0x1d   :  { %v217_v21 = vpop.eup %216  ;;  %v85_v22 = vmul.f32 %v82_v18, %v77_v5  ;;  %v125_v23 = vadd.f32 1.0, %v215_v19 }
  0x1e   :  { %v86_v24 = vmul.f32 %v84_v20, %v78_v7  ;;  %v126_v25 = vadd.f32 1.0, %v217_v21 }
  0x1f   :  { %v87_v26 = vmul.f32 1.442695, %v85_v22  ;;  %v127_v27 = vmul.f32 0.5, %v125_v23 }
  0x20   :  { %v89_v28 = vmul.f32 1.442695, %v86_v24  ;;  %v128_v29 = vmul.f32 0.5, %v126_v25 }
  0x21   :  { %218 = vpow2.f32 %v87_v26  ;;  %v135_v30 = vsub.f32 0.0, %v127_v27  ;;  %v131_v48 = vmul.f32 %v129_v36, %v127_v27 }
  0x22   :  { %220 = vpow2.f32 %v89_v28  ;;  %v136_v31 = vsub.f32 0.0, %v128_v29  ;;  %v132_v51 = vmul.f32 %v130_v37, %v128_v29 }
  0x23   :  { %v137_v32 = vadd.f32 1.0, %v135_v30  ;;  %v140_v33 = vmul.f32 -0.5, %v135_v30  ;;  %v143_v40 = vand.u32 2147483647, %v135_v30  ;;  %v133_v60 = vmul.f32 0.5, %v131_v48 }
  0x24   :  { %v146_v34 = vadd.f32 1.0, %v136_v31  ;;  %v149_v35 = vmul.f32 -0.5, %v136_v31  ;;  %v152_v44 = vand.u32 2147483647, %v136_v31  ;;  %v134_v63 = vmul.f32 0.5, %v132_v51 }
  0x25   :  { %222 = vlog2.f32 %v137_v32  ;;  %v141_v38 = vadd.f32 1.0, %v140_v33  ;;  %vm144_vm6 = vcmp.lt.f32.partialorder %v143_v40, 0.0004427343  ;;  %v159_v3 = vmul.f32 %v131_v48, %v334_v8 }
  0x26   :  { %224 = vlog2.f32 %v146_v34  ;;  %v150_v41 = vadd.f32 1.0, %v149_v35  ;;  %vm153_vm7 = vcmp.lt.f32.partialorder %v152_v44, 0.0004427343  ;;  %v160_v6 = vmul.f32 %v132_v51, %v336_v10 }
  0x27   :  { %v219_v39 = vpop.eup %218  ;;  %v142_v52 = vmul.f32 %v141_v38, %v135_v30 }
  0x28   :  { %v221_v42 = vpop.eup %220  ;;  %v97_v43 = vsel %vm95_vm4, 1.0, %v219_v39  ;;  %v151_v54 = vmul.f32 %v150_v41, %v136_v31 }
  0x29   :  { %v98_v45 = vsel %vm96_vm5, 1.0, %v221_v42  ;;  %v99_v46 = vadd.f32 1.0, %v97_v43  ;;  %v102_v47 = vmul.f32 -0.5, %v97_v43  ;;  %v105_v58 = vand.u32 2147483647, %v97_v43 }
  0x2a   :  { %v108_v49 = vadd.f32 1.0, %v98_v45  ;;  %v111_v50 = vmul.f32 -0.5, %v98_v45  ;;  %v114_v62 = vand.u32 2147483647, %v98_v45 }
  0x2b   :  { %v223_v53 = vpop.eup %222  ;;  %226 = vlog2.f32 %v99_v46  ;;  %v103_v56 = vadd.f32 1.0, %v102_v47  ;;  %vm106_vm8 = vcmp.lt.f32.partialorder %v105_v58, 0.0004427343 }
  0x2c   :  { %v225_v55 = vpop.eup %224  ;;  %228 = vlog2.f32 %v108_v49  ;;  %v139_v57 = vmul.f32 0.6931472, %v223_v53  ;;  %v112_v59 = vadd.f32 1.0, %v111_v50  ;;  %vm115_vm9 = vcmp.lt.f32.partialorder %v114_v62, 0.0004427343 }
  0x2d   :  { %v148_v61 = vmul.f32 0.6931472, %v225_v55  ;;  %v104_v4 = vmul.f32 %v103_v56, %v97_v43 }
  0x2e   :  { %v145_v0 = vsel %vm144_vm6, %v142_v52, %v139_v57  ;;  %v113_v9 = vmul.f32 %v112_v59, %v98_v45 }
  0x2f   :  { %v154_v1 = vsel %vm153_vm7, %v151_v54, %v148_v61  ;;  %v155_v2 = vmul.f32 14.0, %v145_v0 }
  0x30   :  { %v156_v5 = vmul.f32 14.0, %v154_v1 }
  0x31   :  { %v227_v7 = vpop.eup %226  ;;  %v157_v11 = vadd.f32 %v155_v2, %v133_v60 }
  0x32   :  { %v229_v12 = vpop.eup %228  ;;  %v101_v13 = vmul.f32 0.6931472, %v227_v7  ;;  %v158_v14 = vadd.f32 %v156_v5, %v134_v63 }
  0x33   :  { %v110_v15 = vmul.f32 0.6931472, %v229_v12  ;;  %v161_v16 = vsub.f32 %v159_v3, %v157_v11 }
  0x34   :  { %v107_v17 = vsel %vm106_vm8, %v104_v4, %v101_v13  ;;  %v162_v18 = vsub.f32 %v160_v6, %v158_v14 }
  0x35   :  { %v116_v19 = vsel %vm115_vm9, %v113_v9, %v110_v15  ;;  %v117_v20 = vmul.f32 14.0, %v107_v17 }
  0x36   :  { %v118_v21 = vmul.f32 14.0, %v116_v19 }
  0x37   :  { %v165_v22 = vsel %vm163_vm10, %v117_v20, %v161_v16 }
  0x38   :  { %v166_v23 = vsel %vm164_vm11, %v118_v21, %v162_v18 }
  0x39   :  { %v179_v24 = vadd.f32 %v166_v23, %v165_v22 }
  0x3b   :  { %181 = vst [vmem:[#allocation7] sm:$0xff] %v179_v24 }
  0x3c   :  { %192 = dma.vmem_to_hbm [thread:$0]  %s188_s1, 128, %s190_s23, [#allocation4]  }
  0x3d   :  { %306 = dma.done.wait [#allocation4], 128  }
  0x3e   :  { %307 = vsyncadd [#allocation4], 4294967168 }
  0x3f   :  { %197 = vsyncpa [#allocation3], 1 }
  0x40   :  { %198 = vsyncpa [#allocation6], 1 }
  0x41   :  { %199 = vsyncpa [#allocation4], 1 }

</bundles_post_ra>
